<compile_context>
chip_gen: v6e
topology: v6e:2x2x1
jax: 0.10.0
libtpu: 0.0.40
codegen_flags: <defaults>
</compile_context>

<pallas_src>
import functools

import jax
import jax.numpy as jnp
import numpy as np
from jax.experimental import pallas as pl
from jax.experimental.pallas import tpu as pltpu


def _feat_layer_kernel(k, H, W, x_ref, w1_ref, b1_ref, w2_ref, b2_ref,
                       wh_ref, bh_ref, alpha_ref, y_ref, heads_ref,
                       pad1_ref, pad2_ref):
    """Fused FeatLayer forward for one image, channel-major (C, H*W) layout."""
    p = k // 2
    HW = H * W
    s0 = p * W + p          # flat offset of pixel (0,0) inside the row-padded buffer

    # Column-validity masks, one per kernel column offset dw.  They depend only on
    # (dw, W, p), so compute them once and reuse for both convolutions.  The center
    # column (fully valid) gets no mask at all (checked at trace time).
    wcol = jax.lax.broadcasted_iota(jnp.int32, (1, HW), 1) % W
    masks = []
    for dw in range(k):
        lo, hi = p - dw, W + p - dw            # valid output columns: lo <= w < hi
        masks.append(None if (lo <= 0 and hi >= W) else (wcol >= lo) & (wcol < hi))

    def conv_same(pad_ref, x_cm, w_ref, b_ref, alpha):
        """k x k 'same' conv + bias + PReLU as ONE im2col matmul.

        x_cm: (Cin, HW) channel-major activation.  Its zero-padded, row-flattened copy
        lives in pad_ref (Cin, HW + 2*p*W + 2*p); conv tap (dh, dw) is the static lane
        slice pad_ref[:, dh*W+dw : dh*W+dw+HW] with out-of-row columns masked to zero.
        """
        pad_ref[...] = jnp.zeros_like(pad_ref)
        pad_ref[:, s0:s0 + HW] = x_cm.astype(pad_ref.dtype)
        pieces = []
        for dh in range(k):
            for dw in range(k):
                off = dh * W + dw
                sl = pad_ref[:, off:off + HW]               # (Cin, HW) shifted image
                if masks[dw] is not None:
                    sl = jnp.where(masks[dw], sl, jnp.zeros_like(sl))
                pieces.append(sl)
        patches = jnp.concatenate(pieces, axis=0).astype(jnp.bfloat16)  # (k*k*Cin, HW)
        acc = jnp.dot(w_ref[...], patches,
                      preferred_element_type=jnp.float32)   # (C, HW) f32 accumulate
        h = acc + b_ref[...]                                 # + (C, 1) bias
        return jnp.where(h >= 0.0, h, alpha * h)             # PReLU (f32 epilogue)

    # ---- conv1 -> PReLU ------------------------------------------------------
    h1 = conv_same(pad1_ref, x_ref[0], w1_ref, b1_ref, alpha_ref[0])
    # ---- conv2 -> PReLU ------------------------------------------------------
    h2 = conv_same(pad2_ref, h1, w2_ref, b2_ref, alpha_ref[1])

    # nn.Dropout() == identity at inference time.
    # TODO(synk): training-mode dropout via pltpu.prng_seed / prng_random_bits.

    # ---- the two 1x1 heads fused: (2, C) @ (C, HW) ---------------------------
    heads = jnp.dot(wh_ref[...], h2,
                    preferred_element_type=jnp.float32) + bh_ref[...]   # (2, HW)

    # Lane-dense (last dim = H*W), channel-major stores: wrapper only reshapes.
    y_ref[0] = h2
    heads_ref[0] = heads


def init_feat_layer_params(key, in_channel, channel, k):
    # Simple Gaussian init (not a numerical match to PyTorch's Kaiming-uniform);
    # the forward math is what matters here.
    keys = jax.random.split(key, 8)
    s1 = 1.0 / (in_channel * k * k) ** 0.5
    s2 = 1.0 / (channel * k * k) ** 0.5
    s3 = 1.0 / channel ** 0.5
    return {
        "w1": jax.random.normal(keys[0], (k, k, in_channel, channel), jnp.float32) * s1,
        "b1": jax.random.normal(keys[1], (channel,), jnp.float32) * s1,
        "alpha1": jnp.float32(0.25),            # nn.PReLU() default
        "w2": jax.random.normal(keys[2], (k, k, channel, channel), jnp.float32) * s2,
        "b2": jax.random.normal(keys[3], (channel,), jnp.float32) * s2,
        "alpha2": jnp.float32(0.25),
        "wo": jax.random.normal(keys[4], (channel, 1), jnp.float32) * s3,
        "bo": jax.random.normal(keys[5], (1,), jnp.float32) * s3,
        "wo2": jax.random.normal(keys[6], (channel, 1), jnp.float32) * s3,
        "bo2": jax.random.normal(keys[7], (1,), jnp.float32) * s3,
    }


@functools.partial(jax.jit, static_argnames=("k",))
def feat_layer_forward(x_nchw, params, *, k):
    N, Cin, H, W = x_nchw.shape
    C = params["w1"].shape[-1]
    assert k % 2 == 1, "FeatLayer kernel assumes odd k ('same' padding)."
    p = k // 2
    HW = H * W
    L = HW + 2 * p * W + 2 * p          # flat, row-padded buffer length

    # NCHW -> (N, C, H*W): a pure reshape, no transpose / HBM relayout.
    x = x_nchw.reshape(N, Cin, HW).astype(jnp.float32)

    # Tiny host/XLA-side weight prep: im2col-flattened, output-major, bf16 in HBM.
    w1 = params["w1"].reshape(k * k * Cin, C).T.astype(jnp.bfloat16)      # (C, kkCin)
    w2 = params["w2"].reshape(k * k * C, C).T.astype(jnp.bfloat16)        # (C, kkC)
    b1 = params["b1"].reshape(C, 1).astype(jnp.float32)
    b2 = params["b2"].reshape(C, 1).astype(jnp.float32)
    wh = jnp.concatenate([params["wo"], params["wo2"]], axis=1).T.astype(jnp.float32)   # (2, C)
    bh = jnp.concatenate([params["bo"], params["bo2"]], axis=0).reshape(2, 1).astype(jnp.float32)
    alphas = jnp.stack([params["alpha1"], params["alpha2"]]).astype(jnp.float32)

    y_cm, heads_cm = pl.pallas_call(
        functools.partial(_feat_layer_kernel, k, H, W),
        out_shape=(
            jax.ShapeDtypeStruct((N, C, HW), jnp.float32),
            jax.ShapeDtypeStruct((N, 2, HW), jnp.float32),
        ),
        grid=(N,),
        in_specs=[
            pl.BlockSpec((1, Cin, HW), lambda n: (n, 0, 0)),
            pl.BlockSpec((C, k * k * Cin), lambda n: (0, 0)),
            pl.BlockSpec((C, 1), lambda n: (0, 0)),
            pl.BlockSpec((C, k * k * C), lambda n: (0, 0)),
            pl.BlockSpec((C, 1), lambda n: (0, 0)),
            pl.BlockSpec((2, C), lambda n: (0, 0)),
            pl.BlockSpec((2, 1), lambda n: (0, 0)),
            pl.BlockSpec(memory_space=pltpu.MemorySpace.SMEM),   # [alpha1, alpha2]
        ],
        out_specs=(
            pl.BlockSpec((1, C, HW), lambda n: (n, 0, 0)),
            pl.BlockSpec((1, 2, HW), lambda n: (n, 0, 0)),
        ),
        scratch_shapes=[
            pltpu.VMEM((Cin, L), jnp.float32),   # zero-padded, row-flattened input
            pltpu.VMEM((C, L), jnp.float32),     # zero-padded, row-flattened hidden act
        ],
        compiler_params=pltpu.CompilerParams(
            dimension_semantics=("parallel",)),
    )(x, w1, b1, w2, b2, wh, bh, alphas)

    # Outputs are already channel-major: pure reshapes back to NCHW (no data movement).
    y = y_cm.reshape(N, C, H, W)
    heads = heads_cm.reshape(N, 2, H, W)
    return y, heads[:, 0:1], heads[:, 1:2]


def _reference_forward(x_nchw, params, k):
    """Plain-XLA reference with the same bf16-input / f32-accumulate recipe."""
    def conv(x, w, b):
        w_oihw = jnp.transpose(w, (3, 2, 0, 1))
        y = jax.lax.conv_general_dilated(
            x.astype(jnp.bfloat16), w_oihw.astype(jnp.bfloat16),
            window_strides=(1, 1), padding="SAME",
            dimension_numbers=("NCHW", "OIHW", "NCHW"),
            preferred_element_type=jnp.float32)
        return y + b.reshape(1, -1, 1, 1)

    h = conv(x_nchw, params["w1"], params["b1"])
    h = jnp.where(h >= 0, h, params["alpha1"] * h)
    h = conv(h, params["w2"], params["b2"])
    h = jnp.where(h >= 0, h, params["alpha2"] * h)
    hp = jax.lax.Precision.HIGHEST
    y1 = jnp.einsum("nchw,co->nohw", h, params["wo"], precision=hp) \
        + params["bo"].reshape(1, 1, 1, 1)
    y2 = jnp.einsum("nchw,co->nohw", h, params["wo2"], precision=hp) \
        + params["bo2"].reshape(1, 1, 1, 1)
    return h, y1, y2


if __name__ == "__main__":
    in_channel, channel, k = 4, 8, 3
    N, H, W = 2, 16, 16

    key = jax.random.PRNGKey(0)
    k_x, k_p = jax.random.split(key)
    x = jax.random.normal(k_x, (N, in_channel, H, W), jnp.float32)
    params = init_feat_layer_params(k_p, in_channel, channel, k)

    y, y1, y2 = feat_layer_forward(x, params, k=k)
    jax.block_until_ready((y, y1, y2))

    assert y.shape == (N, channel, H, W)
    assert y1.shape == (N, 1, H, W)
    assert y2.shape == (N, 1, H, W)

    y_ref, y1_ref, y2_ref = _reference_forward(x, params, k)
    np.testing.assert_allclose(np.asarray(y), np.asarray(y_ref), rtol=2e-2, atol=2e-2)
    np.testing.assert_allclose(np.asarray(y1), np.asarray(y1_ref), rtol=2e-2, atol=2e-2)
    np.testing.assert_allclose(np.asarray(y2), np.asarray(y2_ref), rtol=2e-2, atol=2e-2)

    print("KERNEL_OK")
</pallas_src>

<mosaic_0001>
module attributes {stable_mosaic.version = 11 : i64} {
  func.func @_feat_layer_kernel(%arg0: i32, %arg1: memref<1x4x256xf32, #tpu.memory_space<vmem>>, %arg2: memref<8x36xbf16, #tpu.memory_space<vmem>>, %arg3: memref<8x1xf32, #tpu.memory_space<vmem>>, %arg4: memref<8x72xbf16, #tpu.memory_space<vmem>>, %arg5: memref<8x1xf32, #tpu.memory_space<vmem>>, %arg6: memref<2x8xf32, #tpu.memory_space<vmem>>, %arg7: memref<2x1xf32, #tpu.memory_space<vmem>>, %arg8: memref<2xf32, #tpu.memory_space<smem>>, %arg9: memref<1x8x256xf32, #tpu.memory_space<vmem>>, %arg10: memref<1x2x256xf32, #tpu.memory_space<vmem>>, %arg11: memref<4x290xf32, #tpu.memory_space<vmem>>, %arg12: memref<8x290xf32, #tpu.memory_space<vmem>>) attributes {dimension_semantics = [#tpu.dimension_semantics<parallel>], iteration_bounds = array<i64: 2>, scalar_prefetch = 0 : i64, scratch_operands = 2 : i64, tpu.core_type = #tpu.core_type<tc>, window_params = [{transform_indices = @transform_0, window_bounds = array<i64: 1, 4, 256>}, {pipeline_mode = #tpu.pipeline_mode<synchronous>, transform_indices = @transform_1, window_bounds = array<i64: 8, 36>}, {pipeline_mode = #tpu.pipeline_mode<synchronous>, transform_indices = @transform_2, window_bounds = array<i64: 8, 1>}, {pipeline_mode = #tpu.pipeline_mode<synchronous>, transform_indices = @transform_3, window_bounds = array<i64: 8, 72>}, {pipeline_mode = #tpu.pipeline_mode<synchronous>, transform_indices = @transform_4, window_bounds = array<i64: 8, 1>}, {pipeline_mode = #tpu.pipeline_mode<synchronous>, transform_indices = @transform_5, window_bounds = array<i64: 2, 8>}, {pipeline_mode = #tpu.pipeline_mode<synchronous>, transform_indices = @transform_6, window_bounds = array<i64: 2, 1>}, {transform_indices = @transform_7, window_bounds = array<i64: 2>}, {transform_indices = @transform_8, window_bounds = array<i64: 1, 8, 256>}, {transform_indices = @transform_9, window_bounds = array<i64: 1, 2, 256>}]} {
    %0 = tpu.iota {dimensions = array<i32: 1>} : vector<1x256xi32>
    %c16_i32 = arith.constant 16 : i32
    %c0_i32 = arith.constant 0 : i32
    %1 = arith.cmpi eq, %c16_i32, %c0_i32 : i32
    %c1_i32 = arith.constant 1 : i32
    %2 = arith.select %1, %c1_i32, %c16_i32 : i32
    %3 = vector.broadcast %2 : i32 to vector<1x256xi32>
    %4 = arith.remsi %0, %3 : vector<1x256xi32>
    %c0_i32_0 = arith.constant 0 : i32
    %5 = vector.broadcast %c0_i32_0 : i32 to vector<1x256xi32>
    %6 = arith.cmpi ne, %4, %5 : vector<1x256xi32>
    %c0_i32_1 = arith.constant 0 : i32
    %7 = vector.broadcast %c0_i32_1 : i32 to vector<1x256xi32>
    %8 = arith.cmpi slt, %4, %7 : vector<1x256xi32>
    %c0_i32_2 = arith.constant 0 : i32
    %9 = arith.cmpi slt, %2, %c0_i32_2 : i32
    %10 = vector.broadcast %9 : i1 to vector<1x256xi1>
    %11 = vector.broadcast %10 : vector<1x256xi1> to vector<1x256xi1>
    %12 = arith.xori %8, %11 : vector<1x256xi1>
    %13 = arith.andi %12, %6 : vector<1x256xi1>
    %14 = vector.broadcast %2 : i32 to vector<1x256xi32>
    %15 = arith.addi %4, %14 : vector<1x256xi32>
    %16 = arith.select %13, %15, %4 : vector<1x256xi1>, vector<1x256xi32>
    %c1_i32_3 = arith.constant 1 : i32
    %17 = vector.broadcast %c1_i32_3 : i32 to vector<1x256xi32>
    %18 = arith.cmpi sge, %16, %17 : vector<1x256xi32>
    %c17_i32 = arith.constant 17 : i32
    %19 = vector.broadcast %c17_i32 : i32 to vector<1x256xi32>
    %20 = arith.cmpi slt, %16, %19 : vector<1x256xi32>
    %21 = arith.andi %18, %20 : vector<1x256xi1>
    %c-1_i32 = arith.constant -1 : i32
    %22 = vector.broadcast %c-1_i32 : i32 to vector<1x256xi32>
    %23 = arith.cmpi sge, %16, %22 : vector<1x256xi32>
    %c15_i32 = arith.constant 15 : i32
    %24 = vector.broadcast %c15_i32 : i32 to vector<1x256xi32>
    %25 = arith.cmpi slt, %16, %24 : vector<1x256xi32>
    %26 = arith.andi %23, %25 : vector<1x256xi1>
    %c0 = arith.constant 0 : index
    %c0_4 = arith.constant 0 : index
    %c0_5 = arith.constant 0 : index
    %27 = vector.load %arg1[%c0, %c0_4, %c0_5] : memref<1x4x256xf32, #tpu.memory_space<vmem>>, vector<1x4x256xf32>
    %28 = vector.shape_cast %27 : vector<1x4x256xf32> to vector<4x256xf32>
    %c0_6 = arith.constant 0 : index
    %29 = memref.load %arg8[%c0_6] : memref<2xf32, #tpu.memory_space<smem>>
    %cst = arith.constant 0.000000e+00 : f32
    %30 = vector.broadcast %cst : f32 to vector<4x290xf32>
    %c0_7 = arith.constant 0 : index
    %c0_8 = arith.constant 0 : index
    %31 = vector.load %arg11[%c0_7, %c0_8] : memref<4x290xf32, #tpu.memory_space<vmem>>, vector<4x290xf32>
    tpu.vector_store %arg11[%c0_7, %c0_8], %30 {strides = array<i32>} : memref<4x290xf32, #tpu.memory_space<vmem>>, vector<4x290xf32>,
    %c0_9 = arith.constant 0 : index
    %c17 = arith.constant 17 : index
    %32 = vector.load %arg11[%c0_9, %c17] : memref<4x290xf32, #tpu.memory_space<vmem>>, vector<4x256xf32>
    tpu.vector_store %arg11[%c0_9, %c17], %28 {strides = array<i32>} : memref<4x290xf32, #tpu.memory_space<vmem>>, vector<4x256xf32>,
    %c0_10 = arith.constant 0 : index
    %c0_11 = arith.constant 0 : index
    %33 = vector.load %arg11[%c0_10, %c0_11] : memref<4x290xf32, #tpu.memory_space<vmem>>, vector<4x256xf32>
    %cst_12 = arith.constant 0.000000e+00 : f32
    %34 = vector.broadcast %cst_12 : f32 to vector<4x256xf32>
    %35 = vector.shape_cast %21 : vector<1x256xi1> to vector<1x256xi1>
    %36 = vector.broadcast %35 : vector<1x256xi1> to vector<4x256xi1>
    %37 = arith.select %36, %33, %34 : vector<4x256xi1>, vector<4x256xf32>
    %c0_13 = arith.constant 0 : index
    %c1 = arith.constant 1 : index
    %38 = vector.load %arg11[%c0_13, %c1] : memref<4x290xf32, #tpu.memory_space<vmem>>, vector<4x256xf32>
    %c0_14 = arith.constant 0 : index
    %c2 = arith.constant 2 : index
    %39 = vector.load %arg11[%c0_14, %c2] : memref<4x290xf32, #tpu.memory_space<vmem>>, vector<4x256xf32>
    %cst_15 = arith.constant 0.000000e+00 : f32
    %40 = vector.broadcast %cst_15 : f32 to vector<4x256xf32>
    %41 = vector.shape_cast %26 : vector<1x256xi1> to vector<1x256xi1>
    %42 = vector.broadcast %41 : vector<1x256xi1> to vector<4x256xi1>
    %43 = arith.select %42, %39, %40 : vector<4x256xi1>, vector<4x256xf32>
    %c0_16 = arith.constant 0 : index
    %c16 = arith.constant 16 : index
    %44 = vector.load %arg11[%c0_16, %c16] : memref<4x290xf32, #tpu.memory_space<vmem>>, vector<4x256xf32>
    %cst_17 = arith.constant 0.000000e+00 : f32
    %45 = vector.broadcast %cst_17 : f32 to vector<4x256xf32>
    %46 = vector.shape_cast %21 : vector<1x256xi1> to vector<1x256xi1>
    %47 = vector.broadcast %46 : vector<1x256xi1> to vector<4x256xi1>
    %48 = arith.select %47, %44, %45 : vector<4x256xi1>, vector<4x256xf32>
    %c0_18 = arith.constant 0 : index
    %c17_19 = arith.constant 17 : index
    %49 = vector.load %arg11[%c0_18, %c17_19] : memref<4x290xf32, #tpu.memory_space<vmem>>, vector<4x256xf32>
    %c0_20 = arith.constant 0 : index
    %c18 = arith.constant 18 : index
    %50 = vector.load %arg11[%c0_20, %c18] : memref<4x290xf32, #tpu.memory_space<vmem>>, vector<4x256xf32>
    %cst_21 = arith.constant 0.000000e+00 : f32
    %51 = vector.broadcast %cst_21 : f32 to vector<4x256xf32>
    %52 = vector.shape_cast %26 : vector<1x256xi1> to vector<1x256xi1>
    %53 = vector.broadcast %52 : vector<1x256xi1> to vector<4x256xi1>
    %54 = arith.select %53, %50, %51 : vector<4x256xi1>, vector<4x256xf32>
    %c0_22 = arith.constant 0 : index
    %c32 = arith.constant 32 : index
    %55 = vector.load %arg11[%c0_22, %c32] : memref<4x290xf32, #tpu.memory_space<vmem>>, vector<4x256xf32>
    %cst_23 = arith.constant 0.000000e+00 : f32
    %56 = vector.broadcast %cst_23 : f32 to vector<4x256xf32>
    %57 = vector.shape_cast %21 : vector<1x256xi1> to vector<1x256xi1>
    %58 = vector.broadcast %57 : vector<1x256xi1> to vector<4x256xi1>
    %59 = arith.select %58, %55, %56 : vector<4x256xi1>, vector<4x256xf32>
    %c0_24 = arith.constant 0 : index
    %c33 = arith.constant 33 : index
    %60 = vector.load %arg11[%c0_24, %c33] : memref<4x290xf32, #tpu.memory_space<vmem>>, vector<4x256xf32>
    %c0_25 = arith.constant 0 : index
    %c34 = arith.constant 34 : index
    %61 = vector.load %arg11[%c0_25, %c34] : memref<4x290xf32, #tpu.memory_space<vmem>>, vector<4x256xf32>
    %cst_26 = arith.constant 0.000000e+00 : f32
    %62 = vector.broadcast %cst_26 : f32 to vector<4x256xf32>
    %63 = vector.shape_cast %26 : vector<1x256xi1> to vector<1x256xi1>
    %64 = vector.broadcast %63 : vector<1x256xi1> to vector<4x256xi1>
    %65 = arith.select %64, %61, %62 : vector<4x256xi1>, vector<4x256xf32>
    %66 = tpu.concatenate %37, %38, %43, %48, %49, %54, %59, %60, %65 in 0 : vector<4x256xf32>, vector<4x256xf32>, vector<4x256xf32>, vector<4x256xf32>, vector<4x256xf32>, vector<4x256xf32>, vector<4x256xf32>, vector<4x256xf32>, vector<4x256xf32> -> vector<36x256xf32>
    %67 = arith.truncf %66 : vector<36x256xf32> to vector<36x256xbf16>
    %c0_27 = arith.constant 0 : index
    %c0_28 = arith.constant 0 : index
    %68 = vector.load %arg2[%c0_27, %c0_28] : memref<8x36xbf16, #tpu.memory_space<vmem>>, vector<8x36xbf16>
    %cst_29 = arith.constant dense<0.000000e+00> : vector<8x256xf32>
    %69 = tpu.matmul %68, %67, %cst_29 {dimension_numbers = #tpu.dot_dimension_numbers<[1], [0], [0], [1], [0, 0, 1, 1], [], []>} : vector<8x36xbf16>, vector<36x256xbf16>, vector<8x256xf32> -> vector<8x256xf32>
    %c0_30 = arith.constant 0 : index
    %c0_31 = arith.constant 0 : index
    %70 = vector.load %arg3[%c0_30, %c0_31] : memref<8x1xf32, #tpu.memory_space<vmem>>, vector<8x1xf32>
    %71 = vector.broadcast %70 : vector<8x1xf32> to vector<8x256xf32>
    %72 = arith.addf %69, %71 : vector<8x256xf32>
    %cst_32 = arith.constant 0.000000e+00 : f32
    %73 = vector.broadcast %cst_32 : f32 to vector<8x256xf32>
    %74 = arith.cmpf oge, %72, %73 : vector<8x256xf32>
    %75 = vector.broadcast %29 : f32 to vector<8x256xf32>
    %76 = arith.mulf %75, %72 : vector<8x256xf32>
    %77 = arith.select %74, %72, %76 : vector<8x256xi1>, vector<8x256xf32>
    %c1_33 = arith.constant 1 : index
    %78 = memref.load %arg8[%c1_33] : memref<2xf32, #tpu.memory_space<smem>>
    %cst_34 = arith.constant 0.000000e+00 : f32
    %79 = vector.broadcast %cst_34 : f32 to vector<8x290xf32>
    %c0_35 = arith.constant 0 : index
    %c0_36 = arith.constant 0 : index
    %80 = vector.load %arg12[%c0_35, %c0_36] : memref<8x290xf32, #tpu.memory_space<vmem>>, vector<8x290xf32>
    tpu.vector_store %arg12[%c0_35, %c0_36], %79 {strides = array<i32>} : memref<8x290xf32, #tpu.memory_space<vmem>>, vector<8x290xf32>,
    %c0_37 = arith.constant 0 : index
    %c17_38 = arith.constant 17 : index
    %81 = vector.load %arg12[%c0_37, %c17_38] : memref<8x290xf32, #tpu.memory_space<vmem>>, vector<8x256xf32>
    tpu.vector_store %arg12[%c0_37, %c17_38], %77 {strides = array<i32>} : memref<8x290xf32, #tpu.memory_space<vmem>>, vector<8x256xf32>,
    %c0_39 = arith.constant 0 : index
    %c0_40 = arith.constant 0 : index
    %82 = vector.load %arg12[%c0_39, %c0_40] : memref<8x290xf32, #tpu.memory_space<vmem>>, vector<8x256xf32>
    %cst_41 = arith.constant 0.000000e+00 : f32
    %83 = vector.broadcast %cst_41 : f32 to vector<8x256xf32>
    %84 = vector.shape_cast %21 : vector<1x256xi1> to vector<1x256xi1>
    %85 = vector.broadcast %84 : vector<1x256xi1> to vector<8x256xi1>
    %86 = arith.select %85, %82, %83 : vector<8x256xi1>, vector<8x256xf32>
    %c0_42 = arith.constant 0 : index
    %c1_43 = arith.constant 1 : index
    %87 = vector.load %arg12[%c0_42, %c1_43] : memref<8x290xf32, #tpu.memory_space<vmem>>, vector<8x256xf32>
    %c0_44 = arith.constant 0 : index
    %c2_45 = arith.constant 2 : index
    %88 = vector.load %arg12[%c0_44, %c2_45] : memref<8x290xf32, #tpu.memory_space<vmem>>, vector<8x256xf32>
    %cst_46 = arith.constant 0.000000e+00 : f32
    %89 = vector.broadcast %cst_46 : f32 to vector<8x256xf32>
    %90 = vector.shape_cast %26 : vector<1x256xi1> to vector<1x256xi1>
    %91 = vector.broadcast %90 : vector<1x256xi1> to vector<8x256xi1>
    %92 = arith.select %91, %88, %89 : vector<8x256xi1>, vector<8x256xf32>
    %c0_47 = arith.constant 0 : index
    %c16_48 = arith.constant 16 : index
    %93 = vector.load %arg12[%c0_47, %c16_48] : memref<8x290xf32, #tpu.memory_space<vmem>>, vector<8x256xf32>
    %cst_49 = arith.constant 0.000000e+00 : f32
    %94 = vector.broadcast %cst_49 : f32 to vector<8x256xf32>
    %95 = vector.shape_cast %21 : vector<1x256xi1> to vector<1x256xi1>
    %96 = vector.broadcast %95 : vector<1x256xi1> to vector<8x256xi1>
    %97 = arith.select %96, %93, %94 : vector<8x256xi1>, vector<8x256xf32>
    %c0_50 = arith.constant 0 : index
    %c17_51 = arith.constant 17 : index
    %98 = vector.load %arg12[%c0_50, %c17_51] : memref<8x290xf32, #tpu.memory_space<vmem>>, vector<8x256xf32>
    %c0_52 = arith.constant 0 : index
    %c18_53 = arith.constant 18 : index
    %99 = vector.load %arg12[%c0_52, %c18_53] : memref<8x290xf32, #tpu.memory_space<vmem>>, vector<8x256xf32>
    %cst_54 = arith.constant 0.000000e+00 : f32
    %100 = vector.broadcast %cst_54 : f32 to vector<8x256xf32>
    %101 = vector.shape_cast %26 : vector<1x256xi1> to vector<1x256xi1>
    %102 = vector.broadcast %101 : vector<1x256xi1> to vector<8x256xi1>
    %103 = arith.select %102, %99, %100 : vector<8x256xi1>, vector<8x256xf32>
    %c0_55 = arith.constant 0 : index
    %c32_56 = arith.constant 32 : index
    %104 = vector.load %arg12[%c0_55, %c32_56] : memref<8x290xf32, #tpu.memory_space<vmem>>, vector<8x256xf32>
    %cst_57 = arith.constant 0.000000e+00 : f32
    %105 = vector.broadcast %cst_57 : f32 to vector<8x256xf32>
    %106 = vector.shape_cast %21 : vector<1x256xi1> to vector<1x256xi1>
    %107 = vector.broadcast %106 : vector<1x256xi1> to vector<8x256xi1>
    %108 = arith.select %107, %104, %105 : vector<8x256xi1>, vector<8x256xf32>
    %c0_58 = arith.constant 0 : index
    %c33_59 = arith.constant 33 : index
    %109 = vector.load %arg12[%c0_58, %c33_59] : memref<8x290xf32, #tpu.memory_space<vmem>>, vector<8x256xf32>
    %c0_60 = arith.constant 0 : index
    %c34_61 = arith.constant 34 : index
    %110 = vector.load %arg12[%c0_60, %c34_61] : memref<8x290xf32, #tpu.memory_space<vmem>>, vector<8x256xf32>
    %cst_62 = arith.constant 0.000000e+00 : f32
    %111 = vector.broadcast %cst_62 : f32 to vector<8x256xf32>
    %112 = vector.shape_cast %26 : vector<1x256xi1> to vector<1x256xi1>
    %113 = vector.broadcast %112 : vector<1x256xi1> to vector<8x256xi1>
    %114 = arith.select %113, %110, %111 : vector<8x256xi1>, vector<8x256xf32>
    %115 = tpu.concatenate %86, %87, %92, %97, %98, %103, %108, %109, %114 in 0 : vector<8x256xf32>, vector<8x256xf32>, vector<8x256xf32>, vector<8x256xf32>, vector<8x256xf32>, vector<8x256xf32>, vector<8x256xf32>, vector<8x256xf32>, vector<8x256xf32> -> vector<72x256xf32>
    %116 = arith.truncf %115 : vector<72x256xf32> to vector<72x256xbf16>
    %c0_63 = arith.constant 0 : index
    %c0_64 = arith.constant 0 : index
    %117 = vector.load %arg4[%c0_63, %c0_64] : memref<8x72xbf16, #tpu.memory_space<vmem>>, vector<8x72xbf16>
    %cst_65 = arith.constant dense<0.000000e+00> : vector<8x256xf32>
    %118 = tpu.matmul %117, %116, %cst_65 {dimension_numbers = #tpu.dot_dimension_numbers<[1], [0], [0], [1], [0, 0, 1, 1], [], []>} : vector<8x72xbf16>, vector<72x256xbf16>, vector<8x256xf32> -> vector<8x256xf32>
    %c0_66 = arith.constant 0 : index
    %c0_67 = arith.constant 0 : index
    %119 = vector.load %arg5[%c0_66, %c0_67] : memref<8x1xf32, #tpu.memory_space<vmem>>, vector<8x1xf32>
    %120 = vector.broadcast %119 : vector<8x1xf32> to vector<8x256xf32>
    %121 = arith.addf %118, %120 : vector<8x256xf32>
    %cst_68 = arith.constant 0.000000e+00 : f32
    %122 = vector.broadcast %cst_68 : f32 to vector<8x256xf32>
    %123 = arith.cmpf oge, %121, %122 : vector<8x256xf32>
    %124 = vector.broadcast %78 : f32 to vector<8x256xf32>
    %125 = arith.mulf %124, %121 : vector<8x256xf32>
    %126 = arith.select %123, %121, %125 : vector<8x256xi1>, vector<8x256xf32>
    %c0_69 = arith.constant 0 : index
    %c0_70 = arith.constant 0 : index
    %127 = vector.load %arg6[%c0_69, %c0_70] : memref<2x8xf32, #tpu.memory_space<vmem>>, vector<2x8xf32>
    %cst_71 = arith.constant dense<0.000000e+00> : vector<2x256xf32>
    %128 = tpu.matmul %127, %126, %cst_71 {dimension_numbers = #tpu.dot_dimension_numbers<[1], [0], [0], [1], [0, 0, 1, 1], [], []>} : vector<2x8xf32>, vector<8x256xf32>, vector<2x256xf32> -> vector<2x256xf32>
    %c0_72 = arith.constant 0 : index
    %c0_73 = arith.constant 0 : index
    %129 = vector.load %arg7[%c0_72, %c0_73] : memref<2x1xf32, #tpu.memory_space<vmem>>, vector<2x1xf32>
    %130 = vector.broadcast %129 : vector<2x1xf32> to vector<2x256xf32>
    %131 = arith.addf %128, %130 : vector<2x256xf32>
    %c0_74 = arith.constant 0 : index
    %c0_75 = arith.constant 0 : index
    %c0_76 = arith.constant 0 : index
    %132 = vector.load %arg9[%c0_74, %c0_75, %c0_76] : memref<1x8x256xf32, #tpu.memory_space<vmem>>, vector<1x8x256xf32>
    %133 = vector.shape_cast %132 : vector<1x8x256xf32> to vector<8x256xf32>
    %134 = vector.shape_cast %126 : vector<8x256xf32> to vector<1x8x256xf32>
    tpu.vector_store %arg9[%c0_74, %c0_75, %c0_76], %134 {strides = array<i32>} : memref<1x8x256xf32, #tpu.memory_space<vmem>>, vector<1x8x256xf32>,
    %c0_77 = arith.constant 0 : index
    %c0_78 = arith.constant 0 : index
    %c0_79 = arith.constant 0 : index
    %135 = vector.load %arg10[%c0_77, %c0_78, %c0_79] : memref<1x2x256xf32, #tpu.memory_space<vmem>>, vector<1x2x256xf32>
    %136 = vector.shape_cast %135 : vector<1x2x256xf32> to vector<2x256xf32>
    %137 = vector.shape_cast %131 : vector<2x256xf32> to vector<1x2x256xf32>
    tpu.vector_store %arg10[%c0_77, %c0_78, %c0_79], %137 {strides = array<i32>} : memref<1x2x256xf32, #tpu.memory_space<vmem>>, vector<1x2x256xf32>,
    return
  }
  func.func @transform_0(%arg0: i32) -> (i32, i32, i32) {
    %c0_i32 = arith.constant 0 : i32
    %c0_i32_0 = arith.constant 0 : i32
    %c0_i32_1 = arith.constant 0 : i32
    return %arg0, %c0_i32, %c0_i32_0 : i32, i32, i32
  }
  func.func @transform_1(%arg0: i32) -> (i32, i32) {
    %c0_i32 = arith.constant 0 : i32
    %c0_i32_0 = arith.constant 0 : i32
    %c0_i32_1 = arith.constant 0 : i32
    return %c0_i32, %c0_i32_0 : i32, i32
  }
  func.func @transform_2(%arg0: i32) -> (i32, i32) {
    %c0_i32 = arith.constant 0 : i32
    %c0_i32_0 = arith.constant 0 : i32
    %c0_i32_1 = arith.constant 0 : i32
    return %c0_i32, %c0_i32_0 : i32, i32
  }
  func.func @transform_3(%arg0: i32) -> (i32, i32) {
    %c0_i32 = arith.constant 0 : i32
    %c0_i32_0 = arith.constant 0 : i32
    %c0_i32_1 = arith.constant 0 : i32
    return %c0_i32, %c0_i32_0 : i32, i32
  }
  func.func @transform_4(%arg0: i32) -> (i32, i32) {
    %c0_i32 = arith.constant 0 : i32
    %c0_i32_0 = arith.constant 0 : i32
    %c0_i32_1 = arith.constant 0 : i32
    return %c0_i32, %c0_i32_0 : i32, i32
  }
  func.func @transform_5(%arg0: i32) -> (i32, i32) {
    %c0_i32 = arith.constant 0 : i32
    %c0_i32_0 = arith.constant 0 : i32
    %c0_i32_1 = arith.constant 0 : i32
    return %c0_i32, %c0_i32_0 : i32, i32
  }
  func.func @transform_6(%arg0: i32) -> (i32, i32) {
    %c0_i32 = arith.constant 0 : i32
    %c0_i32_0 = arith.constant 0 : i32
    %c0_i32_1 = arith.constant 0 : i32
    return %c0_i32, %c0_i32_0 : i32, i32
  }
  func.func @transform_7(%arg0: i32) -> i32 {
    %c0_i32 = arith.constant 0 : i32
    %c0_i32_0 = arith.constant 0 : i32
    return %c0_i32 : i32
  }
  func.func @transform_8(%arg0: i32) -> (i32, i32, i32) {
    %c0_i32 = arith.constant 0 : i32
    %c0_i32_0 = arith.constant 0 : i32
    %c0_i32_1 = arith.constant 0 : i32
    return %arg0, %c0_i32, %c0_i32_0 : i32, i32, i32
  }
  func.func @transform_9(%arg0: i32) -> (i32, i32, i32) {
    %c0_i32 = arith.constant 0 : i32
    %c0_i32_0 = arith.constant 0 : i32
    %c0_i32_1 = arith.constant 0 : i32
    return %arg0, %c0_i32, %c0_i32_0 : i32, i32, i32
  }
}

</mosaic_0001>

<bundles_post_ra>
// kernel: feat_layer_forward.1
= control target key start
LH: loop header
LB: loop body
LE: loop exit
PB: predicated region body
PF: predicated region fallthrough
CT: control target
= control target key end

     0   :  { %15 = vsyncpa [#allocation5], 0  ;;  %s1271_s30 = smov 0   ;;  %s1538_s0 = inlined_call_operand.vmem [shape: f32[2,4,256], index: 0, kind: input, shape index: {}]   ;;  %s1539_s1 = inlined_call_operand.vmem [shape: bf16[8,36], index: 1, kind: input, shape index: {}]   ;;  %s1540_s2 = inlined_call_operand.vmem [shape: f32[8,1], index: 2, kind: input, shape index: {}]   ;;  %s1541_s3 = inlined_call_operand.vmem [shape: bf16[8,72], index: 3, kind: input, shape index: {}]   ;;  %s1542_s4 = inlined_call_operand.vmem [shape: f32[8,1], index: 4, kind: input, shape index: {}]   ;;  %s1543_s5 = inlined_call_operand.vmem [shape: f32[2,8], index: 5, kind: input, shape index: {}]   ;;  %s1544_s6 = inlined_call_operand.vmem [shape: f32[2,1], index: 6, kind: input, shape index: {}]   ;;  %s1545_s7 = inlined_call_operand.vmem [shape: f32[2], index: 7, kind: input, shape index: {}]   ;;  %s1546_s8 = inlined_call_operand.vmem [shape: f32[2,8,256], index: 8, kind: output, shape index: {0}]   ;;  %s1547_s9 = inlined_call_operand.vmem [shape: f32[2,2,256], index: 9, kind: output, shape index: {1}]  }
   0x1 LB: > { %s1277_s10 = sadd.s32 4294967295, %s1206_s30   ;;  %p1018_p0 = scmp.ge.s32.totalorder %s1206_s30, 1  ;;  %s1206_s30 = sphi %s1271_s30, %s21_s30  }
   0x2   : > { %p251_p1 = scmp.lt.s32.totalorder %s1206_s30, 3  ;;  %s282_s13 = sshll.u32 %s1545_s7, 4  ;;  %s283_s13 = int_to_ptr.vmem [resolvable:$true] %s282_s13 }
   0x3   : > { %p1073_p3 = scmp.eq.s32.totalorder %s1277_s10, 0  ;;  %s1181_s15 = scalar_lea.vmem %s283_s13, 16 }
   0x4   : > { %p1284_p2 = pnand %p1018_p0, %p251_p1  ;;  %p1182_p6 = scmp.ne.s32.totalorder %s283_s13, %s1181_s15 }
   0x5   : > { %p1189_p10 = scmp.lt.s32.totalorder %s283_s13, %s283_s13  ;;  %p1190_p11 = scmp.lt.s32.totalorder %s1181_s15, %s1181_s15 }
   0x6   : > { %p1069_p4 = pneg %p1284_p2 }
   0x7   : > { %p1191_p12 = por %p1190_p11, %p1189_p10 }
   0x8   : > { %p1070_p5 = pnand %p1073_p3, %p1069_p4 }
   0xa   : > { %p1183_p7 = pneg %p1070_p5 }
   0xc   : > { %p1184_p8 = pnand %p1183_p7, %p1182_p6 }
   0xe   : > { %p1185_p9 = pneg %p1184_p8 }
  0x10   : > { %p1192_p13 = pnand %p1191_p12, %p1185_p9 }
  0x12   : > { %1195 = shalt.err (!%p1192_p13)
}
  0x13   : > { %s1208_s16 = smov [#allocation4]   ;;  %303 = sbr.rel (%p1284_p2) target bundleno = 1187 (0x4a3), region = 52 }
  0x14   : > { %1072 = dma.vmem_to_smem (!%p1070_p5), %s283_s13, 16, %s1208_s16, [#allocation5]  }
  0x18   : > { %1201 = dma.done.wait (%p1073_p3), [#allocation5], 16  }
  0x19   : > { %1203 = vsyncadd (%p1073_p3), [#allocation5], 4294967280 }
  0x1a   : > { %309 = sfence }
  0x1b   : > { %p345_p0 = scmp.lt.s32.totalorder %s1277_s10, 1  ;;  %vm403_vm0 = vcmask 273408   ;;  %v1209_v0 = vmov 0.0   ;;  %s1210_s21 = smov 17   ;;  %vm413_vm1 = vcmask 1043592   ;;  %vm414_vm2 = vcmask 1047556  }
  0x1c   : > { %402 = vst [vmem:[#allocation2] sm:$0xff] %v1209_v0  ;;  %404 = vst.msk [vmem:[#allocation2 + $0x8] sm:$0xf] %vm403_vm0, %v1209_v0  ;;  %vm409_vm3 = vcmask 138240   ;;  %vm417_vm4 = vcmask 134144   ;;  %s1211_s22 = smov 94   ;;  %v361_v15 = vlaneseq }
  0x1d   : > { %629 = vst [vmem:[#allocation3] sm:$0xff] %v1209_v0  ;;  %s1568_s10 = smov (!%p345_p0, %s1277_s10), 1  ;;  %vm415_vm5 = vmor %vm414_vm2, %vm413_vm1  ;;  %s1212_s23 = smov 110   ;;  %v1217_v13 = vmov 0   ;;  %v563_v14 = vld [vmem:[%s1540_s2] sm:$0xff]  ;;  %vm467_vm6 = vcmask 900096  }
  0x1e   : > { %s1062_s17 = sshll.u32 %s1568_s10, 3  ;;  %s1213_s24 = smov 96   ;;  %612 = vmatprep.mubr.bf16.mxu0 %v1217_v13  ;;  %1136 = vset.pattern.permute.xlu1 %v1217_v13  ;;  %v362_v18 = vand.u32 127, %v361_v15  ;;  %vm480_vm8 = vcmask 785408   ;;  %vm525_vm9 = vcmask 908288   ;;  %vm542_vm10 = vcmask 777216  }
  0x1f   : > { %s349_s20 = scalar_lea.vmem %s1538_s0, %s1062_s17  ;;  %s1214_s25 = smov 111   ;;  %804 = vmatprep.mubr.bf16.mxu1 %v1217_v13  ;;  %1177 = vset.pattern.permute.xlu0 %v1217_v13  ;;  %vm547_vm13 = vcmask 1043456   ;;  %vm493_vm14 = vcmask 769024   ;;  %vm573_vm0 = vcmask 1041408   ;;  %vm454_vm1 = vcmask 916480  }
  0x20   : > { %v400_v1 = vld [vmem:[%s349_s20] sm:$0xff]  ;;  %s1215_s26 = smov 95   ;;  %s1216_s27 = smov 112   ;;  %v363_v21 = vadd.s32 128, %v362_v18  ;;  %v368_v27 = vand.u32 15, %v362_v18  ;;  %vm1549_vm2 = vcmask 1031168  }
  0x21   : > { %406 = vrot.lane.b32.xlu0 %v400_v1, %s1210_s21  ;;  %s1218_s28 = smov 126   ;;  %s1219_s29 = smov 127   ;;  %v755_v39 = vld [vmem:[%s1541_s3] sm:$0xf] }
  0x22   : > { %v375_v26 = vand.u32 15, %v363_v21  ;;  %vm1355_vm11 = vcmp.lt.s32.totalorder %v368_v27, 15  ;;  %vm1361_vm12 = vcmp.ge.s32.totalorder %v368_v27, 1  ;;  %s401_s15 = sld [smem:[#allocation4]] }
  0x24   : > { %vm1348_vm7 = vcmp.lt.s32.totalorder %v375_v26, 15  ;;  %vm1367_vm15 = vcmp.ge.s32.totalorder %v375_v26, 1 }
  0x93   : > { %v407_v2 = vpop.permute.xlu0 %406 }
  0x94   : > { %v408_v3 = vrot.slane %v407_v2, 4 }
  0x96   : > { %v410_v4 = vsel %vm409_vm3, %v408_v3, %v407_v2  ;;  %418 = vst.msk [vmem:[#allocation2 + $0x8] sm:$0xf] %vm417_vm4, %v408_v3  ;;  %vm1548_vm4 = vcmask 1039360  }
  0x97   : > { %416 = vst.msk [vmem:[#allocation2] sm:$0xff] %vm415_vm5, %v410_v4  ;;  %vm569_vm5 = vcmask 293888  }
  0x9d   : > { %v429_v5 = vld [vmem:[#allocation2 + $0x8] sm:$0xf] }
  0x9e   : > { %491 = vrot.lane.b32.xlu1 %v429_v5, %s1211_s22  ;;  %v1313_v6 = vld [vmem:[#allocation2] sm:$0xff]  ;;  %v501_v9 = vcombine.low %v429_v5, %v429_v5 }
  0x9f   : > { %461 = vrot.lane.b32.xlu0 %v1313_v6, %s1212_s23  ;;  %v1319_v7 = vcombine.high %v1313_v6, %v1313_v6  ;;  %v500_v12 = vcombine.low %v1313_v6, %v1313_v6 }
  0xa0   : > { %v1096_v10 = vpack.i.bf16 %v501_v9, %v1313_v6 }
  0xa1   : > { %v1106_v8 = vpack.i.bf16 %v429_v5, %v1319_v7  ;;  %v1101_v11 = vpack.i.bf16 %v1319_v7, %v1313_v6 }
  0xa3   : > { %474 = vrot.lane.b32.xlu0 %v1313_v6, %s1213_s24  ;;  %1107 = vrot.lane.b32.xlu1 %v1106_v8, %s1212_s23 }
  0xa7   : > { %519 = vrot.lane.b32.xlu0 %v1313_v6, %s1214_s25  ;;  %1112 = vrot.lane.b32.xlu1 %v1106_v8, %s1213_s24 }
  0xab   : > { %1097 = vrot.lane.b32.xlu0 %v1096_v10, %s1215_s26  ;;  %1117 = vrot.lane.b32.xlu1 %v1106_v8, %s1214_s25 }
  0xaf   : > { %1122 = vrot.lane.b32.xlu1 %v1106_v8, %s1216_s27  ;;  %1102 = vrot.lane.b32.xlu0 %v1101_v11, %s1211_s22 }
  0xb3   : > { %536 = vrot.lane.b32.xlu1 %v500_v12, %s1215_s26  ;;  %448 = vrot.lane.b32.xlu0 %v1313_v6, %s1216_s27 }
  0xb7   : > { %1127 = vrot.lane.b32.xlu1 %v1106_v8, %s1218_s28  ;;  %435 = vrot.lane.b32.xlu0 %v1313_v6, %s1218_s28 }
  0xbb   : > { %1132 = vrot.lane.b32.xlu1 %v1096_v10, %s1219_s29  ;;  %502 = vrot.lane.b32.xlu0 %v500_v12, %s1219_s29 }
  0xbf   : > { %566 = vperm.xlu1 %1136, %v563_v14  }
 0x110   : > { %v492_v16 = vpop.permute.xlu1 %491 }
 0x111   : > { %v462_v17 = vpop.permute.xlu0 %461 }
 0x115   : > { %v475_v19 = vpop.permute.xlu0 %474  ;;  %v1108_v20 = vpop.permute.xlu1 %1107 }
 0x116   : > { %v1110_v22 = vunpack.i.h.bf16 %v1108_v20  ;;  %v1109_v23 = vunpack.i.l.bf16 %v1108_v20 }
 0x118   : > { %v469_v29 = vsel %vm467_vm6, %v1109_v23, %v1110_v22  ;;  %v468_v40 = vsel %vm467_vm6, %v462_v17, %v1109_v23 }
 0x119   : > { %v520_v24 = vpop.permute.xlu0 %519  ;;  %v1113_v25 = vpop.permute.xlu1 %1112  ;;  %v473_v38 = vsel %vm1348_vm7, %v469_v29, 0.0  ;;  %v472_v51 = vsel %vm1355_vm11, %v468_v40, 0.0 }
 0x11a   : > { %v1115_v30 = vunpack.i.h.bf16 %v1113_v25  ;;  %v1114_v31 = vunpack.i.l.bf16 %v1113_v25  ;;  %v533_v47 = vrot.slane %v473_v38, 4  ;;  %v532_v8 = vrot.slane %v472_v51, 4 }
 0x11c   : > { %v482_v41 = vsel %vm480_vm8, %v1114_v31, %v1115_v30  ;;  %v481_v52 = vsel %vm480_vm8, %v475_v19, %v1114_v31 }
 0x11d   : > { %v1098_v32 = vpop.permute.xlu0 %1097  ;;  %v1118_v33 = vpop.permute.xlu1 %1117  ;;  %v486_v53 = vsel %vm1367_vm15, %v482_v41, 0.0  ;;  %v485_v5 = vsel %vm1361_vm12, %v481_v52, 0.0 }
 0x11e   : > { %v1100_v34 = vunpack.i.h.bf16 %v1098_v32  ;;  %v1099_v35 = vunpack.i.l.bf16 %v1098_v32  ;;  %v1120_v36 = vunpack.i.h.bf16 %v1118_v33  ;;  %v1119_v37 = vunpack.i.l.bf16 %v1118_v33 }
 0x11f   : > { %v427_v33 = vsel %vm1361_vm12, %v1313_v6, 0.0  ;;  %v562_v6 = vld [vmem:[%s1539_s1] sm:$0xf] }
 0x120   : > { %v527_v43 = vsel %vm525_vm9, %v1119_v37, %v1120_v36  ;;  %v544_v46 = vsel %vm542_vm10, %v1099_v35, %v1100_v34  ;;  %v526_v4 = vsel %vm525_vm9, %v520_v24, %v1119_v37 }
 0x121   : > { %v1123_v44 = vpop.permute.xlu1 %1122  ;;  %v1103_v45 = vpop.permute.xlu0 %1102  ;;  %v553_v56 = vsel %vm547_vm13, %v527_v43, %v533_v47  ;;  %v555_v57 = vsel %vm547_vm13, %v486_v53, %v544_v46  ;;  %v552_v18 = vsel %vm547_vm13, %v526_v4, %v532_v8  ;;  %v623_v46 = vstv %s401_s15 }
 0x122   : > { %v1105_v48 = vunpack.i.h.bf16 %v1103_v45  ;;  %v1104_v49 = vunpack.i.l.bf16 %v1103_v45  ;;  %v1125_v58 = vunpack.i.h.bf16 %v1123_v44  ;;  %v1124_v59 = vunpack.i.l.bf16 %v1123_v44 }
 0x123   : > { %v559_v11 = vpack.c.bf16 %v555_v57, %v553_v56 }
 0x124   : > { %v495_v54 = vsel %vm493_vm14, %v1105_v48, %v492_v16  ;;  %v494_v55 = vsel %vm493_vm14, %v1104_v49, %v1105_v48  ;;  %v456_v12 = vsel %vm454_vm1, %v1124_v59, %v1125_v58 }
 0x125   : > { %v537_v60 = vpop.permute.xlu1 %536  ;;  %v449_v61 = vpop.permute.xlu0 %448  ;;  %v499_v62 = vsel %vm1348_vm7, %v495_v54, 0.0  ;;  %v498_v63 = vsel %vm1355_vm11, %v494_v55, 0.0  ;;  %v460_v23 = vsel %vm1367_vm15, %v456_v12, 0.0 }
 0x126   : > { %v543_v1 = vsel %vm542_vm10, %v537_v60, %v1099_v35  ;;  %v561_v2 = vpack.c.bf16 %v499_v62, %v499_v62  ;;  %v560_v3 = vpack.c.bf16 %v498_v63, %v498_v63  ;;  %v455_v13 = vsel %vm454_vm1, %v449_v61, %v1124_v59  ;;  %v821_v63 = vld [vmem:[%s1544_s6] sm:$0x3] }
 0x127   : > { %v554_v9 = vsel %vm547_vm13, %v485_v5, %v543_v1  ;;  %v459_v20 = vsel %vm1361_vm12, %v455_v13, 0.0  ;;  %v516_v32 = vrot.slane %v460_v23, 4  ;;  %v428_v35 = vsel %vm1367_vm15, %v1319_v7, 0.0  ;;  %v756_v1 = vld [vmem:[%s1542_s4] sm:$0xff] }
 0x128   : > { %1029 = vmatprep.subr.msk.bf16.mxu0 %vm573_vm0, %v561_v2  ;;  %v575_v10 = vsel %vm573_vm0, %v560_v3, 0  ;;  %v558_v19 = vpack.c.bf16 %v554_v9, %v552_v18  ;;  %v515_v30 = vrot.slane %v459_v20, 4  ;;  %vm631_vm0 = vcmask 277504  }
 0x129   : > { %v1128_v14 = vpop.permute.xlu1 %1127  ;;  %v436_v15 = vpop.permute.xlu0 %435  ;;  %591 = vmatpush1.bf16.msra.mxu0 %v575_v10  ;;  %632 = vst.msk [vmem:[#allocation3 + $0x10] sm:$0xff] %vm631_vm0, %v1209_v0 }
 0x12a   : > { %v1130_v16 = vunpack.i.h.bf16 %v1128_v14  ;;  %v1129_v17 = vunpack.i.l.bf16 %v1128_v14  ;;  %592 = vmatprep.subr.bf16.mxu0 %v559_v11 }
 0x12c   : > { %v442_v21 = vsel %vm1549_vm2, %v436_v15, %v1129_v17  ;;  %v443_v22 = vsel %vm1549_vm2, %v1129_v17, %v1130_v16 }
 0x12d   : > { %v1133_v24 = vpop.permute.xlu1 %1132  ;;  %593 = vmatpush1.bf16.msra.mxu0 %v558_v19  ;;  %v446_v25 = vsel %vm1355_vm11, %v442_v21, 0.0  ;;  %v447_v29 = vsel %vm1348_vm7, %v443_v22, 0.0  ;;  %v503_v31 = vpop.permute.xlu0 %502 }
 0x12e   : > { %v1135_v26 = vunpack.i.h.bf16 %v1133_v24  ;;  %v1134_v27 = vunpack.i.l.bf16 %v1133_v24  ;;  %v551_v40 = vsel %vm547_vm13, %v447_v29, %v516_v32  ;;  %v550_v41 = vsel %vm547_vm13, %v446_v25, %v515_v30 }
 0x130   : > { %v509_v34 = vsel %vm1548_vm4, %v503_v31, %v1134_v27  ;;  %v510_v36 = vsel %vm1548_vm4, %v1134_v27, %v1135_v26 }
 0x131   : > { %v548_v37 = vsel %vm547_vm13, %v427_v33, %v509_v34  ;;  %v549_v38 = vsel %vm547_vm13, %v428_v35, %v510_v36 }
 0x132   : > { %v557_v43 = vpack.c.bf16 %v551_v40, %v549_v38  ;;  %v556_v44 = vpack.c.bf16 %v550_v41, %v548_v37 }
 0x134   : > { %594 = vmatprep.subr.bf16.mxu0 %v557_v43 }
 0x135   : > { %595 = vmatpush1.bf16.msra.mxu0 %v556_v44 }
 0x138   : > { %1030 = vmatmul.mubr.msk.bf16.vlgmr.msra.gmra.mxu0 %vm569_vm5, %v562_v6  ;;  %vm643_vm5 = vcmask 1047688  }
 0x139   : > { %895 = vmatprep.mubr.f32.mxu0 %v1209_v0 }
 0x13a   : > { %v567_v7 = vpop.permute.xlu1 %566 }
 0x1f8   : > { %v614_v45 = vpop.f32.mrf.mxu0 }
 0x1f9   : > { %v615_v47 = vadd.f32 %v614_v45, %v567_v7 }
 0x1fa   : > { %v616_v48 = vpop.f32.mrf.mxu0 }
 0x1fb   : > { %v624_v49 = vmul.f32 %v623_v46, %v615_v47  ;;  %v617_v51 = vadd.f32 %v616_v48, %v567_v7  ;;  %vm621_vm4 = vcmp.ge.f32.partialorder %v615_v47, 0.0 }
 0x1fc   : > { %v618_v52 = vpop.f32.mrf.mxu0 }
 0x1fd   : > { %v625_v53 = vmul.f32 %v623_v46, %v617_v51  ;;  %v626_v54 = vsel %vm621_vm4, %v615_v47, %v624_v49  ;;  %vm622_vm2 = vcmp.ge.f32.partialorder %v617_v51, 0.0  ;;  %vm1048_vm4 = vmpackc.low %vm1361_vm12, %vm1355_vm11 }
 0x1fe   : > { %v619_v55 = vpop.f32.mrf.mxu0  ;;  %635 = vrot.lane.b32.xlu0 %v626_v54, %s1210_s21 }
 0x1ff   : > { %v627_v56 = vsel %vm622_vm2, %v617_v51, %v625_v53  ;;  %vm1045_vm2 = vmpackc.low %vm1367_vm15, %vm1348_vm7 }
 0x200   : > { %637 = vrot.lane.b32.xlu1 %v627_v56, %s1210_s21 }
 0x270   : > { %v636_v0 = vpop.permute.xlu0 %635 }
 0x271   : > { %644 = vst.msk [vmem:[#allocation3] sm:$0xff] %vm643_vm5, %v636_v0 }
 0x272   : > { %v638_v57 = vpop.permute.xlu1 %637 }
 0x273   : > { %v1424_v58 = vsel %vm409_vm3, %v636_v0, %v638_v57  ;;  %646 = vst.msk [vmem:[#allocation3 + $0x10] sm:$0xff] %vm409_vm3, %v638_v57  ;;  %vm1220_vm3 = vmmov 1  }
 0x278   : > { %v1427_v59 = vld [vmem:[#allocation3] sm:$0xff] }
 0x279   : > { %735 = vrot.lane.b32.xlu1 %v1427_v59, %s1215_s26  ;;  %691 = vrot.lane.b32.xlu0 %v1427_v59, %s1213_s24  ;;  %v1137_v60 = vpack.i.bf16 %v1424_v58, %v1427_v59 }
 0x27a   : > { %v651_v61 = vld [vmem:[#allocation3 + $0x10] sm:$0xff] }
 0x27b   : > { %v1147_v62 = vpack.i.bf16 %v651_v61, %v1424_v58 }
 0x27d   : > { %725 = vrot.lane.b32.xlu1 %v1427_v59, %s1214_s25  ;;  %679 = vrot.lane.b32.xlu0 %v1427_v59, %s1212_s23 }
 0x281   : > { %707 = vrot.lane.b32.xlu1 %v651_v61, %s1211_s22  ;;  %1138 = vrot.lane.b32.xlu0 %v1137_v60, %s1211_s22  ;;  %s1031_s22 = sld [smem:[#allocation4 + $0x1]] }
 0x285   : > { %1148 = vrot.lane.b32.xlu1 %v1147_v62, %s1215_s26  ;;  %655 = vrot.lane.b32.xlu0 %v1427_v59, %s1218_s28 }
 0x289   : > { %1158 = vrot.lane.b32.xlu1 %v1147_v62, %s1214_s25  ;;  %1143 = vrot.lane.b32.xlu0 %v1147_v62, %s1213_s24 }
 0x28d   : > { %1168 = vrot.lane.b32.xlu1 %v1147_v62, %s1216_s27  ;;  %1153 = vrot.lane.b32.xlu0 %v1147_v62, %s1212_s23  ;;  %s1063_s23 = sshll.u32 %s1568_s10, 4 }
 0x28e   : > { %s354_s26 = scalar_lea.vmem %s1546_s8, %s1063_s23 }
 0x291   : > { %667 = vrot.lane.b32.xlu1 %v1427_v59, %s1216_s27  ;;  %1163 = vrot.lane.b32.xlu0 %v1147_v62, %s1218_s28 }
 0x295   : > { %715 = vrot.lane.b32.xlu1 %v1427_v59, %s1219_s29  ;;  %1173 = vrot.lane.b32.xlu0 %v1147_v62, %s1219_s29  ;;  %s1064_s29 = sshll.u32 %s1568_s10, 2 }
 0x296   : > { %s359_s13 = scalar_lea.vmem %s1547_s9, %s1064_s29 }
 0x299   : > { %824 = vperm.xlu1 %1136, %v821_v63   ;;  %759 = vperm.xlu0 %1177, %v756_v1  }
 0x2eb   : > { %v736_v2 = vpop.permute.xlu1 %735  ;;  %v692_v3 = vpop.permute.xlu0 %691 }
 0x2ef   : > { %v726_v4 = vpop.permute.xlu1 %725  ;;  %v680_v5 = vpop.permute.xlu0 %679 }
 0x2f3   : > { %v708_v8 = vpop.permute.xlu1 %707  ;;  %v1139_v9 = vpop.permute.xlu0 %1138 }
 0x2f4   : > { %v1141_v10 = vunpack.i.h.bf16 %v1139_v9  ;;  %v1140_v11 = vunpack.i.l.bf16 %v1139_v9 }
 0x2f6   : > { %v710_v12 = vsel %vm493_vm14, %v1141_v10, %v708_v8  ;;  %v709_v13 = vsel %vm493_vm14, %v1140_v11, %v1141_v10  ;;  %v815_v8 = vstv %s1031_s22 }
 0x2f7   : > { %v1149_v14 = vpop.permute.xlu1 %1148  ;;  %v656_v15 = vpop.permute.xlu0 %655  ;;  %v714_v16 = vsel %vm1348_vm7, %v710_v12, 0.0  ;;  %v713_v17 = vsel %vm1355_vm11, %v709_v13, 0.0 }
 0x2f8   : > { %v754_v18 = vpack.c.bf16 %v714_v16, %v714_v16  ;;  %v753_v19 = vpack.c.bf16 %v713_v17, %v713_v17  ;;  %v1151_v20 = vunpack.i.h.bf16 %v1149_v14  ;;  %v1150_v21 = vunpack.i.l.bf16 %v1149_v14  ;;  %v820_v16 = vld [vmem:[%s1543_s5] sm:$0x3] }
 0x2fa   : > { %1032 = vmatprep.subr.msk.bf16.mxu1 %vm547_vm13, %v754_v18  ;;  %v767_v22 = vsel %vm547_vm13, %v753_v19, 0  ;;  %v741_v30 = vsel %vm542_vm10, %v736_v2, %v1150_v21  ;;  %v742_v31 = vsel %vm542_vm10, %v1150_v21, %v1151_v20  ;;  %vm1476_vm13 = vmpackc.low %vm1220_vm3, %vm1367_vm15  ;;  %vm827_vm15 = vcmask 64512  }
 0x2fb   : > { %v1159_v23 = vpop.permute.xlu1 %1158  ;;  %v1144_v24 = vpop.permute.xlu0 %1143  ;;  %779 = vmatpush1.bf16.msra.mxu1 %v767_v22  ;;  %vm1483_vm10 = vmpackc.low %vm1220_vm3, %vm1361_vm12 }
 0x2fc   : > { %v1146_v25 = vunpack.i.h.bf16 %v1144_v24  ;;  %v1145_v26 = vunpack.i.l.bf16 %v1144_v24  ;;  %v1161_v27 = vunpack.i.h.bf16 %v1159_v23  ;;  %v1160_v29 = vunpack.i.l.bf16 %v1159_v23 }
 0x2fe   : > { %v697_v32 = vsel %vm480_vm8, %v692_v3, %v1145_v26  ;;  %v698_v33 = vsel %vm480_vm8, %v1145_v26, %v1146_v25  ;;  %v731_v44 = vsel %vm525_vm9, %v726_v4, %v1160_v29  ;;  %v732_v6 = vsel %vm525_vm9, %v1160_v29, %v1161_v27  ;;  %vm1039_vm8 = vmpackc.low %vm1348_vm7, %vm1220_vm3 }
 0x2ff   : > { %v1034_v35 = vpack.c.bf16 %v742_v31, %v698_v33  ;;  %v1037_v36 = vpack.c.bf16 %v741_v30, %v697_v32  ;;  %v1169_v37 = vpop.permute.xlu1 %1168  ;;  %v1154_v38 = vpop.permute.xlu0 %1153  ;;  %vm1042_vm9 = vmpackc.low %vm1355_vm11, %vm1220_vm3  ;;  %vm762_vm7 = vcmask 588800  }
 0x300   : > { %v1156_v41 = vunpack.i.h.bf16 %v1154_v38  ;;  %v1155_v43 = vunpack.i.l.bf16 %v1154_v38  ;;  %v1171_v7 = vunpack.i.h.bf16 %v1169_v37  ;;  %v1170_v45 = vunpack.i.l.bf16 %v1169_v37 }
 0x301   : > { %1035 = vmatprep.subr.msk.bf16.mxu1 %vm1476_vm13, %v1034_v35 }
 0x302   : > { %v685_v46 = vsel %vm467_vm6, %v680_v5, %v1155_v43  ;;  %v686_v47 = vsel %vm467_vm6, %v1155_v43, %v1156_v41  ;;  %1038 = vmatpush1.bf16.msk.msra.mxu1 %vm1483_vm10, %v1037_v36  ;;  %v674_v55 = vsel %vm454_vm1, %v1170_v45, %v1171_v7  ;;  %vm1563_vm6 = vcmask 1031168  }
 0x303   : > { %v1040_v48 = vpack.c.bf16 %v686_v47, %v732_v6  ;;  %v1043_v49 = vpack.c.bf16 %v685_v46, %v731_v44  ;;  %v668_v51 = vpop.permute.xlu1 %667  ;;  %v1164_v52 = vpop.permute.xlu0 %1163  ;;  %vm1564_vm14 = vmmov %vm1563_vm6 }
 0x304   : > { %v1166_v53 = vunpack.i.h.bf16 %v1164_v52  ;;  %v1165_v54 = vunpack.i.l.bf16 %v1164_v52  ;;  %v673_v56 = vsel %vm454_vm1, %v668_v51, %v1170_v45  ;;  %vm1565_vm1 = vcmask 1039360  }
 0x305   : > { %1041 = vmatprep.subr.msk.bf16.mxu1 %vm1039_vm8, %v1040_v48  ;;  %vm1566_vm0 = vmmov %vm1565_vm1 }
 0x306   : > { %v661_v0 = vsel %vm1563_vm6, %v656_v15, %v1165_v54  ;;  %v662_v57 = vsel %vm1564_vm14, %v1165_v54, %v1166_v53  ;;  %1044 = vmatpush1.bf16.msk.msra.mxu1 %vm1042_vm9, %v1043_v49 }
 0x307   : > { %v1046_v60 = vpack.c.bf16 %v674_v55, %v662_v57  ;;  %v1049_v61 = vpack.c.bf16 %v673_v56, %v661_v0  ;;  %v1174_v62 = vpop.permute.xlu0 %1173  ;;  %v716_v2 = vpop.permute.xlu1 %715 }
 0x308   : > { %v1176_v63 = vunpack.i.h.bf16 %v1174_v62  ;;  %v1175_v1 = vunpack.i.l.bf16 %v1174_v62 }
 0x309   : > { %1047 = vmatprep.subr.msk.bf16.mxu1 %vm1045_vm2, %v1046_v60 }
 0x30a   : > { %v721_v3 = vsel %vm1565_vm1, %v716_v2, %v1175_v1  ;;  %v722_v28 = vsel %vm1566_vm0, %v1175_v1, %v1176_v63  ;;  %1050 = vmatpush1.bf16.msk.msra.mxu1 %vm1048_vm4, %v1049_v61 }
 0x30b   : > { %v1052_v50 = vpack.c.bf16 %v722_v28, %v1424_v58  ;;  %v1055_v4 = vpack.c.bf16 %v721_v3, %v1427_v59 }
 0x30d   : > { %1053 = vmatprep.subr.msk.bf16.mxu1 %vm1476_vm13, %v1052_v50 }
 0x30e   : > { %1056 = vmatpush1.bf16.msk.msra.mxu1 %vm1483_vm10, %v1055_v4 }
 0x311   : > { %1057 = vmatmul.mubr.msk.bf16.vlgmr.msra.gmra.mxu1 %vm762_vm7, %v755_v39 }
 0x314   : > { %v760_v42 = vpop.permute.xlu0 %759  ;;  %v825_v18 = vpop.permute.xlu1 %824 }
 0x3d1   : > { %v806_v5 = vpop.f32.mrf.mxu1 }
 0x3d2   : > { %v807_v58 = vadd.f32 %v806_v5, %v760_v42 }
 0x3d3   : > { %v808_v9 = vpop.f32.mrf.mxu1 }
 0x3d4   : > { %vm813_vm11 = vcmp.ge.f32.partialorder %v807_v58, 0.0  ;;  %v816_v59 = vmul.f32 %v815_v8, %v807_v58  ;;  %v809_v10 = vadd.f32 %v808_v9, %v760_v42 }
 0x3d5   : > { %v810_v11 = vpop.f32.mrf.mxu1 }
 0x3d6   : > { %v817_v12 = vmul.f32 %v815_v8, %v809_v10  ;;  %vm814_vm12 = vcmp.ge.f32.partialorder %v809_v10, 0.0  ;;  %v818_v13 = vsel %vm813_vm11, %v807_v58, %v816_v59 }
 0x3d7   : > { %v811_v14 = vpop.f32.mrf.mxu1  ;;  %902 = vst [vmem:[%s354_s26] sm:$0xff] %v818_v13 }
 0x3d8   : > { %v819_v15 = vsel %vm814_vm12, %v809_v10, %v817_v12 }
 0x3d9   : > { %861 = vmatprep.subr.mxu0 %v819_v15  ;;  %903 = vst [vmem:[%s354_s26 + $0x8] sm:$0xff] %v819_v15 }
 0x3da   : > { %862 = vmatpush1.msra.mxu0 %v818_v13 }
 0x3db   : > { %1058 = vmatmul.mubr.msk.f32.vlgmr.msra.gmra.mxu0 %vm827_vm15, %v820_v16 }
 0x49b   : > { %v897_v17 = vpop.f32.mrf.mxu0 }
 0x49c   : > { %v898_v20 = vadd.f32 %v897_v17, %v825_v18 }
 0x49d   : > { %v899_v19 = vpop.f32.mrf.mxu0 }
 0x49e   : > { %v900_v21 = vadd.f32 %v899_v19, %v825_v18 }
 0x4a0   : > { %v906_v22 = vcombine.low %v898_v20, %v900_v21 }
 0x4a2   : > { %1059 = vst.sshfl [vmem:[%s359_s13] sm:$0x33 pattern:$0x76325410] %v906_v22 }
 0x4a3 PF: > { %s21_s30 = sadd.s32 1, %s1206_s30  }
 0x4a4   : > { %p18_p1 = scmp.ge.s32.totalorder %s21_s30, 4  }
 0x4a6   :  { %20 = sbr.rel (!%p18_p1) target bundleno = 1 (0x1), region = 99 }
 0x4ab   :  { %953 = vsyncpa [#allocation5], 1 }
 0x4ac   :  { %955 = vsyncpa [#allocation5 + $0x1], 1 }

</bundles_post_ra>
